<compile_context>
chip_gen: v6e
topology: v6e:2x2x1
jax: 0.10.0
libtpu: 0.0.40
codegen_flags: <defaults>
</compile_context>

<pallas_src>
import jax
import jax.numpy as jnp
import numpy as np
from jax.experimental import pallas as pl
from jax.experimental.pallas import tpu as pltpu


def _pool_sum_kernel(x_ref, sum_ref):
    # x_ref:   (TR, TH)  rows = flattened (batch, channel), lanes = spatial
    # sum_ref: (TR, 1)   f32 accumulator, resident across the HW grid axis
    @pl.when(pl.program_id(1) == 0)
    def _():
        sum_ref[...] = jnp.zeros_like(sum_ref)

    sum_ref[...] += jnp.sum(x_ref[...].astype(jnp.float32), axis=1, keepdims=True)


def _scale_kernel(x_ref, s_ref, o_ref):
    # out = x * scale, where scale already folds gamma: scale = 1 + gamma*(attn-1).
    # One multiply per element; (TR,1) scale broadcasts over the lane axis.
    o_ref[...] = (x_ref[...] * s_ref[...]).astype(o_ref.dtype)


def _pick_tile(n, max_tile, quantum):
    """Largest tile <= max_tile that is a multiple of `quantum` and divides n,
    or the full extent if n is small / no clean divisor exists."""
    if n <= max_tile:
        return n
    t = (max_tile // quantum) * quantum
    while t >= quantum:
        if n % t == 0:
            return t
        t -= quantum
    return n


def local_channel(x, weight, bias, gamma):
    """x: (B, C, H, W). weight: (C, C) (conv1x1 squeezed). bias: (C,). gamma: scalar.

    Returns (out (B,C,H,W) in x.dtype, attn_map (B,C,1,1) float32)."""
    B, C, H, W = x.shape
    HW = H * W
    R = B * C
    x2 = x.reshape(R, HW)

    # Tile sizes: keep blocks ~<= 2 MiB so double-buffered in+out fits under the
    # default scoped VMEM limit on every generation (incl. v7x's 64 MiB physical).
    TR = _pick_tile(R, 256, 8)
    TH = _pick_tile(HW, 2048, 128)
    grid = (R // TR, HW // TH)

    # ---- Pass 1: per-(batch, channel) spatial sums (Pallas). -------------------
    row_sum = pl.pallas_call(
        _pool_sum_kernel,
        out_shape=jax.ShapeDtypeStruct((R, 1), jnp.float32),
        grid_spec=pltpu.PrefetchScalarGridSpec(
            num_scalar_prefetch=0,
            grid=grid,
            in_specs=[pl.BlockSpec((TR, TH), lambda i, k: (i, k))],
            out_specs=pl.BlockSpec((TR, 1), lambda i, k: (i, 0)),
        ),
        compiler_params=pltpu.CompilerParams(
            dimension_semantics=("parallel", "arbitrary")),
    )(x2)

    # ---- Tiny glue: one batched 1x1-conv matmul + sigmoid + gamma fold. --------
    # (Done once for all B in plain JAX between the two pallas_calls, as the
    #  perf review suggests; avoids an M=1 MXU matmul inside every grid step.)
    w_eff = weight.astype(jnp.float32).T * jnp.float32(1.0 / HW)   # folds mean's 1/HW
    logits = row_sum.reshape(B, C) @ w_eff + bias.astype(jnp.float32)
    attn = jax.nn.sigmoid(logits)                                  # (B, C)
    g = jnp.asarray(gamma, jnp.float32)
    scale = 1.0 + g * (attn - 1.0)                                 # (B, C)
    scale_rows = scale.reshape(R, 1).astype(x.dtype)

    # ---- Pass 2: out = x * scale (Pallas, fully parallel grid). ----------------
    out2 = pl.pallas_call(
        _scale_kernel,
        out_shape=jax.ShapeDtypeStruct((R, HW), x.dtype),
        grid_spec=pltpu.PrefetchScalarGridSpec(
            num_scalar_prefetch=0,
            grid=grid,
            in_specs=[
                pl.BlockSpec((TR, TH), lambda i, j: (i, j)),   # x tile
                pl.BlockSpec((TR, 1), lambda i, j: (i, 0)),    # per-row scale
            ],
            out_specs=pl.BlockSpec((TR, TH), lambda i, j: (i, j)),
        ),
        compiler_params=pltpu.CompilerParams(
            dimension_semantics=("parallel", "parallel")),
    )(x2, scale_rows)

    out = out2.reshape(B, C, H, W)
    attn_map = attn.reshape(B, C, 1, 1)
    return out, attn_map


if __name__ == "__main__":
    B, C, H, W = 2, 4, 16, 16

    key = jax.random.PRNGKey(0)
    kx, kw, kb = jax.random.split(key, 3)
    x = jax.random.normal(kx, (B, C, H, W), dtype=jnp.float32)

    # Conv1x1 weight (C, C, 1, 1) squeezed -> (C, C); bias (C,).
    weight = jax.random.normal(kw, (C, C), dtype=jnp.float32) * 0.1
    bias = jax.random.normal(kb, (C,), dtype=jnp.float32) * 0.1
    # nn.Parameter(torch.zeros(1)) -> gamma == 0 at init; use a nonzero value so
    # the attention branch is actually exercised (semantics identical for any gamma).
    gamma = jnp.float32(0.25)

    out, attn_map = local_channel(x, weight, bias, gamma)
    out = jax.block_until_ready(out)
    attn_map = jax.block_until_ready(attn_map)

    # Pure-JAX reference matching the PyTorch forward.
    pooled_ref = jnp.mean(x.reshape(B, C, -1), axis=2)                     # (B, C)
    attn_ref = jax.nn.sigmoid(pooled_ref @ weight.T + bias)                # (B, C)
    attn_ref_map = attn_ref.reshape(B, C, 1, 1)
    out_ref = x * (1.0 - gamma) + attn_ref_map * x * gamma

    np.testing.assert_allclose(np.asarray(attn_map), np.asarray(attn_ref_map),
                               rtol=1e-5, atol=1e-5)
    np.testing.assert_allclose(np.asarray(out), np.asarray(out_ref),
                               rtol=1e-5, atol=1e-5)

    print("KERNEL_OK")
</pallas_src>

<mosaic_0001>
module attributes {stable_mosaic.version = 11 : i64} {
  func.func @_pool_sum_kernel(%arg0: i32, %arg1: i32, %arg2: memref<8x256xf32, #tpu.memory_space<vmem>>, %arg3: memref<8x1xf32, #tpu.memory_space<vmem>>) attributes {dimension_semantics = [#tpu.dimension_semantics<parallel>, #tpu.dimension_semantics<arbitrary>], iteration_bounds = array<i64: 1, 1>, scalar_prefetch = 0 : i64, scratch_operands = 0 : i64, tpu.core_type = #tpu.core_type<tc>, window_params = [{transform_indices = @transform_0, window_bounds = array<i64: 8, 256>}, {transform_indices = @transform_1, window_bounds = array<i64: 8, 1>}]} {
    %c0_i32 = arith.constant 0 : i32
    %0 = arith.cmpi eq, %arg1, %c0_i32 : i32
    %1 = arith.extui %0 : i1 to i32
    %c0_i32_0 = arith.constant 0 : i32
    %2 = arith.cmpi ne, %1, %c0_i32_0 : i32
    scf.if %2 {
      %cst_6 = arith.constant 0.000000e+00 : f32
      %9 = vector.broadcast %cst_6 : f32 to vector<8x1xf32>
      %c0_7 = arith.constant 0 : index
      %c0_8 = arith.constant 0 : index
      %10 = vector.load %arg3[%c0_7, %c0_8] : memref<8x1xf32, #tpu.memory_space<vmem>>, vector<8x1xf32>
      tpu.vector_store %arg3[%c0_7, %c0_8], %9 {strides = array<i32>} : memref<8x1xf32, #tpu.memory_space<vmem>>, vector<8x1xf32>,
    } else {
    }
    %c0 = arith.constant 0 : index
    %c0_1 = arith.constant 0 : index
    %3 = vector.load %arg3[%c0, %c0_1] : memref<8x1xf32, #tpu.memory_space<vmem>>, vector<8x1xf32>
    %c0_2 = arith.constant 0 : index
    %c0_3 = arith.constant 0 : index
    %4 = vector.load %arg2[%c0_2, %c0_3] : memref<8x256xf32, #tpu.memory_space<vmem>>, vector<8x256xf32>
    %cst = arith.constant dense<0.000000e+00> : vector<8xf32>
    %5 = vector.multi_reduction <add>, %4, %cst [1] : vector<8x256xf32> to vector<8xf32>
    %6 = vector.shape_cast %5 : vector<8xf32> to vector<8x1xf32>
    %7 = arith.addf %3, %6 : vector<8x1xf32>
    %c0_4 = arith.constant 0 : index
    %c0_5 = arith.constant 0 : index
    %8 = vector.load %arg3[%c0_4, %c0_5] : memref<8x1xf32, #tpu.memory_space<vmem>>, vector<8x1xf32>
    tpu.vector_store %arg3[%c0_4, %c0_5], %7 {strides = array<i32>} : memref<8x1xf32, #tpu.memory_space<vmem>>, vector<8x1xf32>,
    return
  }
  func.func @transform_0(%arg0: i32, %arg1: i32) -> (i32, i32) {
    %c0_i32 = arith.constant 0 : i32
    return %arg0, %arg1 : i32, i32
  }
  func.func @transform_1(%arg0: i32, %arg1: i32) -> (i32, i32) {
    %c0_i32 = arith.constant 0 : i32
    %c0_i32_0 = arith.constant 0 : i32
    return %arg0, %c0_i32 : i32, i32
  }
}

</mosaic_0001>

<bundles_post_ra>
// kernel: tpu_custom_call.1
= control target key start
LH: loop header
LB: loop body
LE: loop exit
PB: predicated region body
PF: predicated region fallthrough
CT: control target
= control target key end

     0   :  { %6 = vsyncpa [#allocation3], 0  ;;  %s64_s6 = smov [#allocation2]   ;;  %s88_s0 = inlined_call_operand.hbm [shape: f32[8,256], index: 0, kind: input, shape index: {}]   ;;  %s89_s1 = inlined_call_operand.vmem [shape: f32[8,1], index: 1, kind: output, shape index: {}]  }
   0x1   :  { %s13_s7 = sshll.u32 %s64_s6, 4  ;;  %s14_s7 = int_to_ptr.vmem [resolvable:$true] %s13_s7 }
   0x2   :  { %s50_s8 = scalar_lea.vmem %s14_s7, 256  ;;  %p55_p1 = scmp.lt.s32.totalorder %s14_s7, %s14_s7 }
   0x3   :  { %p51_p0 = scmp.ne.s32.totalorder %s14_s7, %s50_s8  ;;  %p56_p2 = scmp.lt.s32.totalorder %s50_s8, %s50_s8 }
   0x5   :  { %p57_p3 = por %p56_p2, %p55_p1 }
   0x7   :  { %p58_p4 = pnand %p57_p3, %p51_p0 }
   0x9   :  { %61 = shalt.err (!%p58_p4)
}
   0xa   :  { %16 = dma.hbm_to_vmem [thread:$0]  %s88_s0, 256, %s14_s7, [#allocation3]  }
   0xb   :  { %62 = dma.done.wait [#allocation3], 256  }
   0xc   :  { %63 = vsyncadd [#allocation3], 4294967040  ;;  %vm24_vm0 = vcmask 7168   ;;  %v65_v0 = vmov 0.0   ;;  %v27_v1 = vld [vmem:[#allocation2] sm:$0xff]  ;;  %v28_v2 = vld [vmem:[#allocation2 + $0x8] sm:$0xff] }
   0xd   :  { %25 = vst.msk [vmem:[%s89_s1] sm:$0xff] %vm24_vm0, %v65_v0  ;;  %v29_v3 = vadd.f32 %v28_v2, %v27_v1 }
   0xf   :  { %30 = vadd.xlane.f32.xlu0 %v29_v3 }
  0x14   :  { %v26_v4 = vld [vmem:[%s89_s1] sm:$0xff] }
  0x98   :  { %v31_v5 = vpop.xlane.xlu0 %30 }
  0x99   :  { %v32_v6 = vadd.f32 %v31_v5, %v26_v4 }
  0x9b   :  { %34 = vst.msk [vmem:[%s89_s1] sm:$0xff] %vm24_vm0, %v32_v6 }
  0x9c   :  { %39 = vsyncpa [#allocation3], 1 }

</bundles_post_ra>
